<compile_context>
chip_gen: v7x
topology: tpu7x:2x2x1
jax: 0.10.0
libtpu: 0.0.40
codegen_flags: <defaults>
</compile_context>

<pallas_src>
import functools

import numpy as np
import jax
import jax.numpy as jnp
from jax.experimental import pallas as pl
from jax.experimental.pallas import tpu as pltpu


# --------------------------------------------------------------------------
# Kernel
# --------------------------------------------------------------------------
def cbp_kernel(x1_ref, x2_ref, w1_ref, w2_ref, fc_ref, fs_ref, o_ref,
               x1t_ref, x2t_ref, acc_ref, *, inv_scale):
    f32 = jnp.float32
    bf16 = jnp.bfloat16
    fidx = pl.program_id(1)
    n_freq = pl.num_programs(1)
    tf = fc_ref.shape[0]                      # frequency-chunk width (static)

    # Fold permute(0, 2, 1).view(-1, D) into the kernel, once per batch tile:
    # (TB, D, W) -> (TB, W, D) -> (TB*W, D), done on bf16 data (XLU work).
    @pl.when(fidx == 0)
    def _():
        tb, d1, w = x1_ref.shape
        d2 = x2_ref.shape[1]
        x1t_ref[...] = jnp.transpose(x1_ref[...], (0, 2, 1)).reshape(tb * w, d1)
        x2t_ref[...] = jnp.transpose(x2_ref[...], (0, 2, 1)).reshape(tb * w, d2)
        acc_ref[...] = jnp.zeros_like(acc_ref)

    # Fused count-sketch + forward real-DFT for this frequency chunk.
    # w*_ref packs [cos | sin] columns for the chunk -> one matmul each input.
    f1 = jnp.dot(x1t_ref[...], w1_ref[...], preferred_element_type=f32)
    f2 = jnp.dot(x2t_ref[...], w2_ref[...], preferred_element_type=f32)
    re1, im1 = f1[:, :tf], f1[:, tf:]          # 128-aligned lane slices
    re2, im2 = f2[:, :tf], f2[:, tf:]

    # Complex elementwise product in the frequency domain, f32 on the VPU.
    # The ifft 1/OD scale is applied here in f32 (not baked into bf16 weights).
    rp = (re1 * re2 - im1 * im2) * inv_scale
    ip = (re1 * im2 + im1 * re2) * inv_scale

    # Real part of the inverse DFT for this chunk; accumulate over chunks.
    acc_ref[...] += (
        jnp.dot(rp.astype(bf16), fc_ref[...], preferred_element_type=f32)
        + jnp.dot(ip.astype(bf16), fs_ref[...], preferred_element_type=f32))

    @pl.when(fidx == n_freq - 1)
    def _():
        o_ref[...] = acc_ref[...].astype(o_ref.dtype)


# --------------------------------------------------------------------------
# Tiling helpers
# --------------------------------------------------------------------------
def _pick_freq_tile(od_pad, target=512):
    """Frequency-chunk width: multiple of 128 dividing od_pad, <= target."""
    tf = max(128, (min(od_pad, target) // 128) * 128)
    while od_pad % tf != 0:
        tf -= 128
    return tf


def _pick_batch_tile(batch, width, od_pad):
    """Batch tile: a few hundred MXU rows per step, accumulator <= ~8 MiB,
    and >= 2 grid steps per v7x TensorCore when the batch allows it."""
    max_rows = max(width, min(512, (8 << 20) // max(od_pad * 4, 1)))
    tb = max(1, min(batch, max(1, max_rows // max(width, 1))))
    while batch % tb != 0:
        tb -= 1
    min_steps = min(batch, 4)            # >= 2 per TC on v7x when possible
    while tb > 1 and batch // tb < min_steps:
        tb -= 1
        while batch % tb != 0:
            tb -= 1
    return tb


def _compute_vmem_limit(tb, w, d1, d2, odp, tf, rows, weight_bufs):
    bf, f4 = 2, 4
    in_bytes = 2 * tb * (d1 + d2) * w * bf                 # 2-deep bf16 inputs
    w_bytes = weight_bufs * ((d1 + d2) * 2 * tf + 2 * tf * odp) * bf
    out_bytes = 2 * rows * odp * f4                        # output block bufs
    scratch = rows * (d1 + d2) * bf + rows * odp * f4      # x1t/x2t + acc
    interm = 8 * rows * tf * f4                            # f1,f2,rp,ip,...
    need = in_bytes + w_bytes + out_bytes + scratch + interm
    limit = int(need * 1.25) + (8 << 20)
    cap = 64 << 20                                         # v7x-safe fallback
    try:
        info = pltpu.get_tpu_info()
        cap = int(getattr(info, "vmem_capacity_bytes", cap))
    except Exception:
        pass
    limit = max(limit, 32 << 20)
    limit = min(limit, cap - (4 << 20))
    return limit


def _spec(shape, index_map, buffers=None):
    """BlockSpec, optionally requesting an explicit pipeline buffer count."""
    if buffers is not None:
        try:
            return pl.BlockSpec(shape, index_map,
                                pipeline_mode=pl.Buffered(buffers))
        except TypeError:        # older BlockSpec signature
            pass
    return pl.BlockSpec(shape, index_map)


# --------------------------------------------------------------------------
# Wrapper
# --------------------------------------------------------------------------
def cbp_forward(bottom1, bottom2, params, out_dtype=jnp.float32):
    B, H, W = bottom1.shape            # H is the channel dim (== input_dim1)
    D1, D2 = params["d1"], params["d2"]
    OD, ODp, TF = params["output_dim"], params["od_pad"], params["tf"]
    assert H == D1 and bottom2.shape[1] == D2
    assert H == W, "original module's final .view requires height == width"
    assert W % 8 == 0, "width must be a multiple of 8 (sublane alignment)"

    TB = _pick_batch_tile(B, W, ODp)
    n_batch = B // TB
    n_freq = ODp // TF
    rows = TB * W
    N = B * W

    # bf16 inputs: halves input HBM->VMEM DMA and the in-kernel transpose cost.
    x1 = bottom1.astype(jnp.bfloat16)
    x2 = bottom2.astype(jnp.bfloat16)

    # Single-buffer the weights when their block index is grid-invariant.
    weight_bufs = 1 if n_freq == 1 else None
    vmem_limit = _compute_vmem_limit(TB, W, D1, D2, ODp, TF, rows,
                                     1 if n_freq == 1 else 2)

    flops = (2 * N * 2 * ODp * (D1 + D2)     # fused sketch + forward DFT
             + 8 * N * ODp                   # complex product + scale
             + 2 * 2 * N * ODp * ODp)        # inverse DFT (two matmuls)
    bytes_accessed = (N * (D1 + D2) * 2 + N * ODp * 4
                      + n_batch * ((D1 + D2) * 2 * ODp + 2 * ODp * ODp) * 2)
    cost = pl.CostEstimate(flops=int(flops), transcendentals=0,
                           bytes_accessed=int(bytes_accessed))

    kernel = functools.partial(cbp_kernel, inv_scale=1.0 / OD)

    out_flat = pl.pallas_call(
        kernel,
        out_shape=jax.ShapeDtypeStruct((N, ODp), out_dtype),
        grid_spec=pltpu.PrefetchScalarGridSpec(
            num_scalar_prefetch=0,
            grid=(n_batch, n_freq),
            in_specs=[
                pl.BlockSpec((TB, D1, W), lambda i, f: (i, 0, 0)),
                pl.BlockSpec((TB, D2, W), lambda i, f: (i, 0, 0)),
                _spec((D1, 2 * TF), lambda i, f: (0, f), weight_bufs),
                _spec((D2, 2 * TF), lambda i, f: (0, f), weight_bufs),
                _spec((TF, ODp), lambda i, f: (f, 0), weight_bufs),
                _spec((TF, ODp), lambda i, f: (f, 0), weight_bufs),
            ],
            out_specs=pl.BlockSpec((rows, ODp), lambda i, f: (i, 0)),
            scratch_shapes=[
                pltpu.VMEM((rows, D1), jnp.bfloat16),   # transposed bottom1
                pltpu.VMEM((rows, D2), jnp.bfloat16),   # transposed bottom2
                pltpu.VMEM((rows, ODp), jnp.float32),   # output accumulator
            ],
        ),
        compiler_params=pltpu.CompilerParams(
            dimension_semantics=("parallel", "arbitrary"),
            vmem_limit_bytes=vmem_limit,
        ),
        cost_estimate=cost,
    )(x1, x2, params["w1"], params["w2"], params["finv_c"], params["finv_s"])

    # Drop the lane padding and apply the module's final .view.
    return out_flat[:, :OD].reshape(B, W, OD)


# --------------------------------------------------------------------------
# Parameter construction (matches the PyTorch module's seeded init)
# --------------------------------------------------------------------------
def generate_sketch_matrix(rand_h, rand_s, output_dim):
    input_dim = len(rand_h)
    m = np.zeros((input_dim, output_dim), dtype=np.float64)
    m[np.arange(input_dim), rand_h.astype(np.int64)] = rand_s.astype(np.float64)
    return m


def make_cbp_params(input_dim1, input_dim2, output_dim):
    np.random.seed(1)
    rand_h_1 = np.random.randint(output_dim, size=input_dim1)
    np.random.seed(3)
    rand_s_1 = 2 * np.random.randint(2, size=input_dim1) - 1
    np.random.seed(5)
    rand_h_2 = np.random.randint(output_dim, size=input_dim2)
    np.random.seed(7)
    rand_s_2 = 2 * np.random.randint(2, size=input_dim2) - 1
    S1 = generate_sketch_matrix(rand_h_1, rand_s_1, output_dim)
    S2 = generate_sketch_matrix(rand_h_2, rand_s_2, output_dim)

    # Real DFT matrices: Fc[j,k] = cos(2*pi*j*k/OD), Fs[j,k] = -sin(2*pi*j*k/OD)
    k = np.arange(output_dim)
    ang = 2.0 * np.pi * np.outer(k, k).astype(np.float64) / output_dim
    Fc = np.cos(ang)
    Fs = -np.sin(ang)

    od_pad = ((output_dim + 127) // 128) * 128   # lane-dense frequency axis
    tf = _pick_freq_tile(od_pad)
    n_freq = od_pad // tf

    def pad_cols(m):
        out = np.zeros((m.shape[0], od_pad), dtype=np.float64)
        out[:, :output_dim] = m
        return out

    # Fused count-sketch + forward DFT: re = x @ (S @ Fc), im = x @ (S @ Fs).
    w1c, w1s = pad_cols(S1 @ Fc), pad_cols(S1 @ Fs)
    w2c, w2s = pad_cols(S2 @ Fc), pad_cols(S2 @ Fs)

    # Pack [cos | sin] per frequency chunk so one (D, 2*TF) block per grid step.
    def pack_chunks(wc, ws):
        d = wc.shape[0]
        out = np.zeros((d, 2 * od_pad), dtype=np.float64)
        for f in range(n_freq):
            out[:, f * 2 * tf:f * 2 * tf + tf] = wc[:, f * tf:(f + 1) * tf]
            out[:, f * 2 * tf + tf:(f + 1) * 2 * tf] = ws[:, f * tf:(f + 1) * tf]
        return out

    w1 = pack_chunks(w1c, w1s)
    w2 = pack_chunks(w2c, w2s)

    # Inverse-DFT halves (unscaled; the 1/OD scale is applied in f32 in-kernel).
    finv_c = np.zeros((od_pad, od_pad), dtype=np.float64)
    finv_s = np.zeros((od_pad, od_pad), dtype=np.float64)
    finv_c[:output_dim, :output_dim] = Fc
    finv_s[:output_dim, :output_dim] = Fs

    bf16 = jnp.bfloat16
    return dict(
        d1=input_dim1, d2=input_dim2,
        output_dim=output_dim, od_pad=od_pad, tf=tf,
        w1=jnp.asarray(w1, dtype=bf16),
        w2=jnp.asarray(w2, dtype=bf16),
        finv_c=jnp.asarray(finv_c, dtype=bf16),
        finv_s=jnp.asarray(finv_s, dtype=bf16),
        S1=jnp.asarray(S1, dtype=jnp.float32),   # for the pure-JAX reference
        S2=jnp.asarray(S2, dtype=jnp.float32),
    )


def cbp_reference(bottom1, bottom2, S1, S2):
    # Pure-JAX reference following the PyTorch code path (uses jnp.fft, f32).
    B, H, W = bottom1.shape
    D1, OD = S1.shape
    D2 = S2.shape[0]
    x1 = jnp.transpose(bottom1, (0, 2, 1)).reshape(-1, D1)
    x2 = jnp.transpose(bottom2, (0, 2, 1)).reshape(-1, D2)
    sk1 = x1 @ S1
    sk2 = x2 @ S2
    cbp_flat = jnp.real(jnp.fft.ifft(jnp.fft.fft(sk1) * jnp.fft.fft(sk2)))
    return cbp_flat.reshape(B, H, OD).astype(jnp.float32)


if __name__ == "__main__":
    B, D1, D2, W, OD = 2, 16, 16, 16, 32   # bottom: (B, input_dim, W), H == W

    key = jax.random.PRNGKey(0)
    k1, k2 = jax.random.split(key)
    bottom1 = jax.random.normal(k1, (B, D1, W), dtype=jnp.float32)
    bottom2 = jax.random.normal(k2, (B, D2, W), dtype=jnp.float32)

    params = make_cbp_params(D1, D2, OD)

    out = jax.block_until_ready(cbp_forward(bottom1, bottom2, params))

    # Reference from the same bf16-rounded inputs the kernel consumes.
    b1_q = bottom1.astype(jnp.bfloat16).astype(jnp.float32)
    b2_q = bottom2.astype(jnp.bfloat16).astype(jnp.float32)
    ref = jax.block_until_ready(
        cbp_reference(b1_q, b2_q, params["S1"], params["S2"]))

    assert out.shape == (B, D1, OD)
    out_np = np.asarray(out, dtype=np.float64)
    ref_np = np.asarray(ref, dtype=np.float64)
    # bf16 MXU operands with f32 accumulation: ~0.2-0.5% relative error.
    np.testing.assert_allclose(out_np, ref_np, rtol=2e-2, atol=5e-2)
    rel_l2 = np.linalg.norm(out_np - ref_np) / np.linalg.norm(ref_np)
    assert rel_l2 < 1e-2, f"relative L2 error too large: {rel_l2}"
    print("KERNEL_OK")
</pallas_src>

<mosaic_0001>
module attributes {stable_mosaic.version = 11 : i64} {
  func.func @cbp_kernel(%arg0: i32, %arg1: i32, %arg2: memref<1x16x16xbf16, #tpu.memory_space<vmem>>, %arg3: memref<1x16x16xbf16, #tpu.memory_space<vmem>>, %arg4: memref<16x256xbf16, #tpu.memory_space<vmem>>, %arg5: memref<16x256xbf16, #tpu.memory_space<vmem>>, %arg6: memref<128x128xbf16, #tpu.memory_space<vmem>>, %arg7: memref<128x128xbf16, #tpu.memory_space<vmem>>, %arg8: memref<16x128xf32, #tpu.memory_space<vmem>>, %arg9: memref<16x16xbf16, #tpu.memory_space<vmem>>, %arg10: memref<16x16xbf16, #tpu.memory_space<vmem>>, %arg11: memref<16x128xf32, #tpu.memory_space<vmem>>) attributes {dimension_semantics = [#tpu.dimension_semantics<parallel>, #tpu.dimension_semantics<arbitrary>], iteration_bounds = array<i64: 2, 1>, scalar_prefetch = 0 : i64, scratch_operands = 3 : i64, tpu.core_type = #tpu.core_type<tc>, window_params = [{transform_indices = @transform_0, window_bounds = array<i64: 1, 16, 16>}, {transform_indices = @transform_1, window_bounds = array<i64: 1, 16, 16>}, {pipeline_mode = #tpu.pipeline_mode<synchronous>, transform_indices = @transform_2, window_bounds = array<i64: 16, 256>}, {pipeline_mode = #tpu.pipeline_mode<synchronous>, transform_indices = @transform_3, window_bounds = array<i64: 16, 256>}, {pipeline_mode = #tpu.pipeline_mode<synchronous>, transform_indices = @transform_4, window_bounds = array<i64: 128, 128>}, {pipeline_mode = #tpu.pipeline_mode<synchronous>, transform_indices = @transform_5, window_bounds = array<i64: 128, 128>}, {transform_indices = @transform_6, window_bounds = array<i64: 16, 128>}]} {
    %c0_i32 = arith.constant 0 : i32
    %0 = arith.cmpi eq, %arg1, %c0_i32 : i32
    %1 = arith.extui %0 : i1 to i32
    %c0_i32_0 = arith.constant 0 : i32
    %2 = arith.cmpi ne, %1, %c0_i32_0 : i32
    scf.if %2 {
      %c0_23 = arith.constant 0 : index
      %c0_24 = arith.constant 0 : index
      %c0_25 = arith.constant 0 : index
      %36 = vector.load %arg2[%c0_23, %c0_24, %c0_25] : memref<1x16x16xbf16, #tpu.memory_space<vmem>>, vector<1x16x16xbf16>
      %37 = tpu.transpose %36, [0, 2, 1] : vector<1x16x16xbf16> -> vector<1x16x16xbf16>
      %38 = vector.shape_cast %37 : vector<1x16x16xbf16> to vector<16x16xbf16>
      %c0_26 = arith.constant 0 : index
      %c0_27 = arith.constant 0 : index
      %39 = vector.load %arg9[%c0_26, %c0_27] : memref<16x16xbf16, #tpu.memory_space<vmem>>, vector<16x16xbf16>
      tpu.vector_store %arg9[%c0_26, %c0_27], %38 {strides = array<i32>} : memref<16x16xbf16, #tpu.memory_space<vmem>>, vector<16x16xbf16>,
      %c0_28 = arith.constant 0 : index
      %c0_29 = arith.constant 0 : index
      %c0_30 = arith.constant 0 : index
      %40 = vector.load %arg3[%c0_28, %c0_29, %c0_30] : memref<1x16x16xbf16, #tpu.memory_space<vmem>>, vector<1x16x16xbf16>
      %41 = tpu.transpose %40, [0, 2, 1] : vector<1x16x16xbf16> -> vector<1x16x16xbf16>
      %42 = vector.shape_cast %41 : vector<1x16x16xbf16> to vector<16x16xbf16>
      %c0_31 = arith.constant 0 : index
      %c0_32 = arith.constant 0 : index
      %43 = vector.load %arg10[%c0_31, %c0_32] : memref<16x16xbf16, #tpu.memory_space<vmem>>, vector<16x16xbf16>
      tpu.vector_store %arg10[%c0_31, %c0_32], %42 {strides = array<i32>} : memref<16x16xbf16, #tpu.memory_space<vmem>>, vector<16x16xbf16>,
      %cst_33 = arith.constant 0.000000e+00 : f32
      %44 = vector.broadcast %cst_33 : f32 to vector<16x128xf32>
      %c0_34 = arith.constant 0 : index
      %c0_35 = arith.constant 0 : index
      %45 = vector.load %arg11[%c0_34, %c0_35] : memref<16x128xf32, #tpu.memory_space<vmem>>, vector<16x128xf32>
      tpu.vector_store %arg11[%c0_34, %c0_35], %44 {strides = array<i32>} : memref<16x128xf32, #tpu.memory_space<vmem>>, vector<16x128xf32>,
    } else {
    }
    %c0 = arith.constant 0 : index
    %c0_1 = arith.constant 0 : index
    %3 = vector.load %arg9[%c0, %c0_1] : memref<16x16xbf16, #tpu.memory_space<vmem>>, vector<16x16xbf16>
    %c0_2 = arith.constant 0 : index
    %c0_3 = arith.constant 0 : index
    %4 = vector.load %arg4[%c0_2, %c0_3] : memref<16x256xbf16, #tpu.memory_space<vmem>>, vector<16x256xbf16>
    %cst = arith.constant dense<0.000000e+00> : vector<16x256xf32>
    %5 = tpu.matmul %3, %4, %cst {dimension_numbers = #tpu.dot_dimension_numbers<[1], [0], [0], [1], [0, 0, 1, 1], [], []>} : vector<16x16xbf16>, vector<16x256xbf16>, vector<16x256xf32> -> vector<16x256xf32>
    %c0_4 = arith.constant 0 : index
    %c0_5 = arith.constant 0 : index
    %6 = vector.load %arg10[%c0_4, %c0_5] : memref<16x16xbf16, #tpu.memory_space<vmem>>, vector<16x16xbf16>
    %c0_6 = arith.constant 0 : index
    %c0_7 = arith.constant 0 : index
    %7 = vector.load %arg5[%c0_6, %c0_7] : memref<16x256xbf16, #tpu.memory_space<vmem>>, vector<16x256xbf16>
    %cst_8 = arith.constant dense<0.000000e+00> : vector<16x256xf32>
    %8 = tpu.matmul %6, %7, %cst_8 {dimension_numbers = #tpu.dot_dimension_numbers<[1], [0], [0], [1], [0, 0, 1, 1], [], []>} : vector<16x16xbf16>, vector<16x256xbf16>, vector<16x256xf32> -> vector<16x256xf32>
    %9 = vector.extract_strided_slice %5 {offsets = [0, 0], sizes = [16, 128], strides = [1, 1]} : vector<16x256xf32> to vector<16x128xf32>
    %10 = vector.extract_strided_slice %5 {offsets = [0, 128], sizes = [16, 128], strides = [1, 1]} : vector<16x256xf32> to vector<16x128xf32>
    %11 = vector.extract_strided_slice %8 {offsets = [0, 0], sizes = [16, 128], strides = [1, 1]} : vector<16x256xf32> to vector<16x128xf32>
    %12 = vector.extract_strided_slice %8 {offsets = [0, 128], sizes = [16, 128], strides = [1, 1]} : vector<16x256xf32> to vector<16x128xf32>
    %13 = arith.mulf %9, %11 : vector<16x128xf32>
    %14 = arith.mulf %10, %12 : vector<16x128xf32>
    %15 = arith.subf %13, %14 : vector<16x128xf32>
    %cst_9 = arith.constant 3.125000e-02 : f32
    %16 = vector.broadcast %cst_9 : f32 to vector<16x128xf32>
    %17 = arith.mulf %15, %16 : vector<16x128xf32>
    %18 = arith.mulf %9, %12 : vector<16x128xf32>
    %19 = arith.mulf %10, %11 : vector<16x128xf32>
    %20 = arith.addf %18, %19 : vector<16x128xf32>
    %cst_10 = arith.constant 3.125000e-02 : f32
    %21 = vector.broadcast %cst_10 : f32 to vector<16x128xf32>
    %22 = arith.mulf %20, %21 : vector<16x128xf32>
    %c0_11 = arith.constant 0 : index
    %c0_12 = arith.constant 0 : index
    %23 = vector.load %arg11[%c0_11, %c0_12] : memref<16x128xf32, #tpu.memory_space<vmem>>, vector<16x128xf32>
    %24 = arith.truncf %17 : vector<16x128xf32> to vector<16x128xbf16>
    %c0_13 = arith.constant 0 : index
    %c0_14 = arith.constant 0 : index
    %25 = vector.load %arg6[%c0_13, %c0_14] : memref<128x128xbf16, #tpu.memory_space<vmem>>, vector<128x128xbf16>
    %cst_15 = arith.constant dense<0.000000e+00> : vector<16x128xf32>
    %26 = tpu.matmul %24, %25, %cst_15 {dimension_numbers = #tpu.dot_dimension_numbers<[1], [0], [0], [1], [0, 0, 1, 1], [], []>} : vector<16x128xbf16>, vector<128x128xbf16>, vector<16x128xf32> -> vector<16x128xf32>
    %27 = arith.truncf %22 : vector<16x128xf32> to vector<16x128xbf16>
    %c0_16 = arith.constant 0 : index
    %c0_17 = arith.constant 0 : index
    %28 = vector.load %arg7[%c0_16, %c0_17] : memref<128x128xbf16, #tpu.memory_space<vmem>>, vector<128x128xbf16>
    %cst_18 = arith.constant dense<0.000000e+00> : vector<16x128xf32>
    %29 = tpu.matmul %27, %28, %cst_18 {dimension_numbers = #tpu.dot_dimension_numbers<[1], [0], [0], [1], [0, 0, 1, 1], [], []>} : vector<16x128xbf16>, vector<128x128xbf16>, vector<16x128xf32> -> vector<16x128xf32>
    %30 = arith.addf %26, %29 : vector<16x128xf32>
    %31 = arith.addf %23, %30 : vector<16x128xf32>
    %c0_19 = arith.constant 0 : index
    %c0_20 = arith.constant 0 : index
    %32 = vector.load %arg11[%c0_19, %c0_20] : memref<16x128xf32, #tpu.memory_space<vmem>>, vector<16x128xf32>
    tpu.vector_store %arg11[%c0_19, %c0_20], %31 {strides = array<i32>} : memref<16x128xf32, #tpu.memory_space<vmem>>, vector<16x128xf32>,
    %c0_i32_21 = arith.constant 0 : i32
    %33 = arith.cmpi eq, %arg1, %c0_i32_21 : i32
    %34 = arith.extui %33 : i1 to i32
    %c0_i32_22 = arith.constant 0 : i32
    %35 = arith.cmpi ne, %34, %c0_i32_22 : i32
    scf.if %35 {
      %c0_23 = arith.constant 0 : index
      %c0_24 = arith.constant 0 : index
      %36 = vector.load %arg11[%c0_23, %c0_24] : memref<16x128xf32, #tpu.memory_space<vmem>>, vector<16x128xf32>
      %c0_25 = arith.constant 0 : index
      %c0_26 = arith.constant 0 : index
      %37 = vector.load %arg8[%c0_25, %c0_26] : memref<16x128xf32, #tpu.memory_space<vmem>>, vector<16x128xf32>
      tpu.vector_store %arg8[%c0_25, %c0_26], %36 {strides = array<i32>} : memref<16x128xf32, #tpu.memory_space<vmem>>, vector<16x128xf32>,
    } else {
    }
    return
  }
  func.func @transform_0(%arg0: i32, %arg1: i32) -> (i32, i32, i32) {
    %c0_i32 = arith.constant 0 : i32
    %c0_i32_0 = arith.constant 0 : i32
    %c0_i32_1 = arith.constant 0 : i32
    return %arg0, %c0_i32, %c0_i32_0 : i32, i32, i32
  }
  func.func @transform_1(%arg0: i32, %arg1: i32) -> (i32, i32, i32) {
    %c0_i32 = arith.constant 0 : i32
    %c0_i32_0 = arith.constant 0 : i32
    %c0_i32_1 = arith.constant 0 : i32
    return %arg0, %c0_i32, %c0_i32_0 : i32, i32, i32
  }
  func.func @transform_2(%arg0: i32, %arg1: i32) -> (i32, i32) {
    %c0_i32 = arith.constant 0 : i32
    %c0_i32_0 = arith.constant 0 : i32
    return %c0_i32, %arg1 : i32, i32
  }
  func.func @transform_3(%arg0: i32, %arg1: i32) -> (i32, i32) {
    %c0_i32 = arith.constant 0 : i32
    %c0_i32_0 = arith.constant 0 : i32
    return %c0_i32, %arg1 : i32, i32
  }
  func.func @transform_4(%arg0: i32, %arg1: i32) -> (i32, i32) {
    %c0_i32 = arith.constant 0 : i32
    %c0_i32_0 = arith.constant 0 : i32
    return %arg1, %c0_i32 : i32, i32
  }
  func.func @transform_5(%arg0: i32, %arg1: i32) -> (i32, i32) {
    %c0_i32 = arith.constant 0 : i32
    %c0_i32_0 = arith.constant 0 : i32
    return %arg1, %c0_i32 : i32, i32
  }
  func.func @transform_6(%arg0: i32, %arg1: i32) -> (i32, i32) {
    %c0_i32 = arith.constant 0 : i32
    %c0_i32_0 = arith.constant 0 : i32
    return %arg0, %c0_i32 : i32, i32
  }
}

</mosaic_0001>

<bundles_post_ra>
// kernel: tpu_custom_call.1
= control target key start
LH: loop header
LB: loop body
LE: loop exit
PB: predicated region body
PF: predicated region fallthrough
CT: control target
= control target key end

     0   :  { %s1931_s0 = inlined_call_operand.hbm [shape: bf16[2,16,16], index: 0, kind: input, shape index: {}]   ;;  %s1932_s1 = inlined_call_operand.hbm [shape: bf16[2,16,16], index: 1, kind: input, shape index: {}]   ;;  %s1933_s2 = inlined_call_operand.hbm [shape: bf16[16,256], index: 2, kind: input, shape index: {}]   ;;  %s1934_s3 = inlined_call_operand.hbm [shape: bf16[16,256], index: 3, kind: input, shape index: {}]   ;;  %s1935_s4 = inlined_call_operand.hbm [shape: bf16[128,128], index: 4, kind: input, shape index: {}]   ;;  %s1936_s5 = inlined_call_operand.hbm [shape: bf16[128,128], index: 5, kind: input, shape index: {}]   ;;  %s1937_s6 = inlined_call_operand.hbm [shape: f32[32,128], index: 6, kind: output, shape index: {}]  }
   0x1   :  { %1947 = sst [smem:[#allocation25_spill]] %s1931_s0 }
   0x2   :  { %1948 = sst [smem:[#allocation26_spill]] %s1933_s2 }
   0x3   :  { %1949 = sst [smem:[#allocation27_spill]] %s1934_s3 }
   0x4   :  { %1950 = sst [smem:[#allocation28_spill]] %s1935_s4 }
   0x5   :  { %1951 = sst [smem:[#allocation29_spill]] %s1936_s5 }
   0x6   :  { %11 = vsyncpa [#allocation6], 0 }
   0x7   :  { %13 = vsyncpa [#allocation6 + $0x1], 0 }
   0x8   :  { %14 = vsyncpa [#allocation9], 0 }
   0x9   :  { %16 = vsyncpa [#allocation9 + $0x1], 0 }
   0xa   :  { %17 = vsyncpa [#allocation12], 0 }
   0xb   :  { %18 = vsyncpa [#allocation15], 0 }
   0xc   :  { %19 = vsyncpa [#allocation7], 0 }
   0xd   :  { %21 = vsyncpa [#allocation7 + $0x1], 0  ;;  %s1577_s21 = smov 0   ;;  %s1579_s22 = smov 0  }
   0xe   :  { %s1581_s23 = smov 0   ;;  %s1583_s24 = smov 0  }
   0xf   :  { %s1585_s25 = smov 0   ;;  %s1587_s26 = smov 0  }
  0x10 LB: > { %1952 = sst [smem:[#allocation23_spill]] %s1504_s21  ;;  %s1608_s27 = sadd.s32 4294967295, %s1524_s26   ;;  %s1524_s26 = sphi %s1587_s26, %s27_s26   ;;  %s1520_s25 = sphi %s1585_s25, %s1985_s25   ;;  %s1516_s24 = sphi %s1583_s24, %s1984_s24   ;;  %s1512_s23 = sphi %s1581_s23, %s1983_s23   ;;  %s1508_s22 = sphi %s1579_s22, %s1982_s22   ;;  %s1504_s21 = sphi %s1577_s21, %s1981_s21  }
  0x11   : > { %s1000_s28 = sadd.s32 4294967294, %s1524_s26   ;;  %p59_p0 = scmp.ne.s32.totalorder %s1508_s22, %s1504_s21 }
  0x12   : > { %p1938_p1 = scmp.eq.s32.totalorder %s1608_s27, 0  ;;  %p219_p3 = scmp.eq.s32.totalorder %s1000_s28, 1 }
  0x13   : > { %p1001_p5 = scmp.ge.s32.totalorder %s1524_s26, 1  ;;  %p226_p7 = scmp.lt.s32.totalorder %s1524_s26, 3 }
  0x14   : > { %p1617_p4 = por %p1938_p1, %p59_p0  ;;  %p1622_p6 = por %p219_p3, %p59_p0 }
  0x15   : > { %p1627_p8 = pnand %p1001_p5, %p226_p7  ;;  %s1526_s8 = smov [#allocation10]  }
  0x16   : > { %s1953_s29 = scalar_select %p1617_p4, 1, 0 }
  0x17   : > { %s1954_s30 = scalar_select %p1622_p6, 1, 0 }
  0x18   : > { %s1956_s7 = scalar_select %p1627_p8, 1, 0 }
  0x19   : > { %1955 = sst [smem:[#allocation24_spill]] %s1954_s30  ;;  %s241_s9 = sshll.u32 %s1526_s8, 4  ;;  %s1631_s9 = int_to_ptr.vmem [resolvable:$true] %s241_s9 }
  0x1a   : > { %p1135_p9 = pneg %p1627_p8  ;;  %s1527_s11 = smov [#allocation11]  }
  0x1b   : > { %s257_s12 = sshll.u32 %s1527_s11, 4  ;;  %s1528_s13 = smov [#allocation13]   ;;  %s1642_s12 = int_to_ptr.vmem [resolvable:$true] %s257_s12 }
  0x1c   : > { %p1638_p11 = pnand %p1135_p9, %p1938_p1  ;;  %s1644_s14 = sshll.u32 %s1528_s13, 4  ;;  %s274_s14 = int_to_ptr.vmem [resolvable:$true] %s1644_s14 }
  0x1d   : > { %s1958_s2 = sld [smem:[#allocation26_spill]] }
  0x1e   : > { %p1654_p13 = pneg %p1638_p11 }
  0x23   : > { %s1254_s17 = scalar_lea.hbm %s1958_s2, 256 }
  0x24   : > { %p1255_p12 = scmp.ne.s32.totalorder %s1958_s2, %s1254_s17  ;;  %p1261_p5 = scmp.lt.u32.totalorder %s1254_s17, %s1958_s2 }
  0x26   : > { %p1257_p0 = pnand %p1654_p13, %p1255_p12 }
  0x28   : > { %p1258_p3 = pneg %p1257_p0 }
  0x2a   : > { %p1263_p7 = pnand %p1261_p5, %p1258_p3 }
  0x2c   : > { %1266 = shalt.err (!%p1263_p7)
}
  0x2d   : > { %s1267_s11 = scalar_lea.vmem %s1631_s9, 256  ;;  %p1275_p2 = scmp.lt.s32.totalorder %s1631_s9, %s1631_s9 }
  0x2e   : > { %p1268_p9 = scmp.ne.s32.totalorder %s1631_s9, %s1267_s11  ;;  %p1276_p6 = scmp.lt.s32.totalorder %s1267_s11, %s1267_s11 }
  0x30   : > { %p1270_p10 = pnand %p1268_p9, %p1654_p13  ;;  %p1277_p12 = por %p1276_p6, %p1275_p2 }
  0x32   : > { %p1271_p1 = pneg %p1270_p10 }
  0x34   : > { %p1278_p0 = pnand %p1277_p12, %p1271_p1 }
  0x36   : > { %1281 = shalt.err (!%p1278_p0)
}
  0x37   : > { %s1529_s13 = smov 128   ;;  %s1530_s15 = smov 8  }
  0x38   : > { %1138 = dma.hbm_to_vmem [thread:$0]  (!%p1638_p11), %s1958_s2, 256, %s1631_s9, [#allocation9], %s1529_s13, %s1529_s13, %s1530_s15  }
  0x39   : > { %s1960_s3 = sld [smem:[#allocation27_spill]] }
  0x3f   : > { %s1282_s28 = scalar_lea.hbm %s1960_s3, 256 }
  0x40   : > { %p1283_p2 = scmp.ne.s32.totalorder %s1960_s3, %s1282_s28  ;;  %p1289_p10 = scmp.lt.u32.totalorder %s1282_s28, %s1960_s3 }
  0x42   : > { %p1285_p1 = pnand %p1283_p2, %p1654_p13 }
  0x44   : > { %p1286_p6 = pneg %p1285_p1 }
  0x46   : > { %p1291_p3 = pnand %p1289_p10, %p1286_p6 }
  0x48   : > { %1294 = shalt.err (!%p1291_p3)
}
  0x49   : > { %s1295_s9 = scalar_lea.vmem %s1642_s12, 256  ;;  %p1303_p12 = scmp.lt.s32.totalorder %s1642_s12, %s1642_s12 }
  0x4a   : > { %p1296_p5 = scmp.ne.s32.totalorder %s1642_s12, %s1295_s9  ;;  %p1304_p0 = scmp.lt.s32.totalorder %s1295_s9, %s1295_s9 }
  0x4c   : > { %p1298_p7 = pnand %p1296_p5, %p1654_p13  ;;  %p1305_p2 = por %p1304_p0, %p1303_p12 }
  0x4e   : > { %p1299_p9 = pneg %p1298_p7 }
  0x50   : > { %p1306_p1 = pnand %p1305_p2, %p1299_p9 }
  0x52   : > { %1309 = shalt.err (!%p1306_p1)
}
  0x53   : > { %1141 = dma.hbm_to_vmem [thread:$0]  (!%p1638_p11), %s1960_s3, 256, %s1642_s12, [#allocation12], %s1529_s13, %s1529_s13, %s1530_s15  }
  0x54   : > { %s1961_s4 = sld [smem:[#allocation28_spill]] }
  0x5a   : > { %s1310_s18 = scalar_lea.hbm %s1961_s4, 1024 }
  0x5b   : > { %p1311_p6 = scmp.ne.s32.totalorder %s1961_s4, %s1310_s18  ;;  %p1317_p5 = scmp.lt.u32.totalorder %s1310_s18, %s1961_s4 }
  0x5d   : > { %p1313_p10 = pnand %p1311_p6, %p1654_p13 }
  0x5f   : > { %p1314_p3 = pneg %p1313_p10 }
  0x61   : > { %p1319_p7 = pnand %p1317_p5, %p1314_p3 }
  0x63   : > { %1322 = shalt.err (!%p1319_p7)
}
  0x64   : > { %s1323_s9 = scalar_lea.vmem %s274_s14, 1024  ;;  %p1331_p2 = scmp.lt.s32.totalorder %s274_s14, %s274_s14 }
  0x65   : > { %p1324_p9 = scmp.ne.s32.totalorder %s274_s14, %s1323_s9  ;;  %p1332_p1 = scmp.lt.s32.totalorder %s1323_s9, %s1323_s9 }
  0x67   : > { %p1326_p12 = pnand %p1324_p9, %p1654_p13  ;;  %p1333_p4 = por %p1332_p1, %p1331_p2 }
  0x69   : > { %p1327_p0 = pneg %p1326_p12 }
  0x6b   : > { %p1334_p8 = pnand %p1333_p4, %p1327_p0 }
  0x6d   : > { %1337 = shalt.err (!%p1334_p8)
}
  0x6e   : > { %s1943_s12 = smov 64   ;;  %s1945_s13 = smov 4  }
  0x6f   : > { %1144 = dma.hbm_to_vmem [thread:$0]  (!%p1638_p11), %s1961_s4, 1024, %s274_s14, [#allocation12], %s1943_s12, %s1943_s12, %s1945_s13  }
  0x70   : > { %s1533_s30 = smov [#allocation14]   ;;  %s1962_s5 = sld [smem:[#allocation29_spill]] }
  0x71   : > { %s289_s16 = sshll.u32 %s1533_s30, 4  ;;  %s290_s16 = int_to_ptr.vmem [resolvable:$true] %s289_s16 }
  0x76   : > { %s1338_s19 = scalar_lea.hbm %s1962_s5, 1024 }
  0x77   : > { %p1339_p4 = scmp.ne.s32.totalorder %s1962_s5, %s1338_s19  ;;  %p1345_p10 = scmp.lt.u32.totalorder %s1338_s19, %s1962_s5 }
  0x79   : > { %p1341_p8 = pnand %p1339_p4, %p1654_p13 }
  0x7b   : > { %p1342_p6 = pneg %p1341_p8 }
  0x7d   : > { %p1347_p3 = pnand %p1345_p10, %p1342_p6 }
  0x7f   : > { %1350 = shalt.err (!%p1347_p3)
}
  0x80   : > { %s1351_s14 = scalar_lea.vmem %s290_s16, 1024  ;;  %p1359_p12 = scmp.lt.s32.totalorder %s290_s16, %s290_s16 }
  0x81   : > { %p1352_p5 = scmp.ne.s32.totalorder %s290_s16, %s1351_s14  ;;  %p1360_p0 = scmp.lt.s32.totalorder %s1351_s14, %s1351_s14 }
  0x83   : > { %p1354_p7 = pnand %p1352_p5, %p1654_p13  ;;  %p1361_p2 = por %p1360_p0, %p1359_p12 }
  0x85   : > { %p1355_p9 = pneg %p1354_p7 }
  0x87   : > { %p1362_p1 = pnand %p1361_p2, %p1355_p9 }
  0x89   : > { %1365 = shalt.err (!%p1362_p1)
}
  0x8a   : > { %1147 = dma.hbm_to_vmem [thread:$0]  (!%p1638_p11), %s1962_s5, 1024, %s290_s16, [#allocation15], %s1943_s12, %s1943_s12, %s1945_s13  }
  0x8b   : > { %s39_s20 = sadd.s32 1, %s1520_s25  ;;  %s46_s10 = sadd.s32 1, %s1512_s23 }
  0x8c   : > { %p41_p13 = scmp.ge.s32.totalorder %s39_s20, 2  ;;  %p53_p4 = scmp.ne.s32.totalorder %s1512_s23, %s1508_s22 }
  0x8d   : > { %p54_p8 = scmp.eq.s32.totalorder %s1524_s26, 0  ;;  %p1163_p6 = scmp.lt.s32.totalorder %s1524_s26, 2 }
  0x8e   : > { %s1987_s20 = smov (%p41_p13, %s39_s20), 0  ;;  %p1963_p3 = scmp.eq.s32.totalorder %s1608_s27, 1 }
  0x8f   : > { %p55_p10 = por %p54_p8, %p53_p4  ;;  %s43_s17 = ssub.s32 %s1520_s25, %s1987_s20 }
  0x90   : > { %p1751_p5 = por %p1963_p3, %p53_p4  ;;  %s303_s18 = sand.u32 1, %s1512_s23  }
  0x91   : > { %p44_p7 = scmp.eq.s32.totalorder %s43_s17, 0  ;;  %s1758_s16 = sshll.u32 %s303_s18, 3 }
  0x92   : > { %s1050_s19 = sshll.u32 %s1520_s25, 7  ;;  %s1965_s0 = sld [smem:[#allocation25_spill]] }
  0x93   : > { %s1762_s28 = scalar_select %p44_p7, %s1512_s23, %s46_s10  }
  0x94   : > { %s307_s14 = scalar_lea.vmem [#allocation5], %s1758_s16  ;;  %p1772_p11 = pnand %p1163_p6, %p55_p10 }
  0x95   : > { %s314_s15 = sshll.u32 %s307_s14, 4  ;;  %s1781_s8 = scalar_lea.hbm %s1932_s1, %s1050_s19  ;;  %s1776_s15 = int_to_ptr.vmem [resolvable:$true] %s314_s15 }
  0x96   : > { %s1783_s11 = scalar_lea.sflag [#allocation6], %s303_s18  ;;  %p1368_p12 = pneg %p1772_p11 }
  0x98   : > { %s1767_s9 = scalar_lea.hbm %s1965_s0, %s1050_s19  ;;  %s1371_s2 = scalar_lea.hbm %s1965_s0, 256 }
  0x99   : > { %s1366_s12 = scalar_lea.hbm %s1767_s9, 128  ;;  %p1372_p1 = scmp.lt.u32.totalorder %s1767_s9, %s1965_s0 }
  0x9a   : > { %p1367_p9 = scmp.ne.s32.totalorder %s1767_s9, %s1366_s12  ;;  %p1373_p13 = scmp.lt.u32.totalorder %s1371_s2, %s1366_s12 }
  0x9b   : > { %p1375_p8 = scmp.lt.u32.totalorder %s1366_s12, %s1767_s9 }
  0x9c   : > { %p1369_p0 = pnand %p1368_p12, %p1367_p9  ;;  %p1374_p4 = por %p1373_p13, %p1372_p1 }
  0x9e   : > { %p1370_p2 = pneg %p1369_p0  ;;  %p1376_p6 = por %p1375_p8, %p1374_p4 }
  0xa0   : > { %p1377_p10 = pnand %p1376_p6, %p1370_p2 }
  0xa2   : > { %1380 = shalt.err (!%p1377_p10)
}
  0xa3   : > { %s1381_s18 = scalar_lea.vmem %s1776_s15, 128  ;;  %s1534_s13 = smov [#allocation5]  }
  0xa4   : > { %p1382_p3 = scmp.ne.s32.totalorder %s1776_s15, %s1381_s18  ;;  %s1386_s19 = sshll.u32 %s1534_s13, 4  ;;  %s1387_s19 = int_to_ptr.vmem [resolvable:$false] %s1386_s19 }
  0xa5   : > { %s1388_s3 = scalar_lea.vmem %s1387_s19, 256  ;;  %p1389_p0 = scmp.lt.s32.totalorder %s1776_s15, %s1387_s19 }
  0xa6   : > { %p1384_p7 = pnand %p1382_p3, %p1368_p12  ;;  %p1390_p1 = scmp.lt.s32.totalorder %s1388_s3, %s1381_s18 }
  0xa8   : > { %p1385_p9 = pneg %p1384_p7  ;;  %p1391_p13 = por %p1390_p1, %p1389_p0 }
  0xaa   : > { %p1392_p4 = pnand %p1391_p13, %p1385_p9 }
  0xac   : > { %1395 = shalt.err (!%p1392_p4)
}
  0xad   : > { %s1967_s2 = smov 4   ;;  %s1968_s4 = smov 64  }
  0xae   : > { %1151 = dma.hbm_to_vmem [thread:$0]  (!%p1772_p11), %s1767_s9, 128, %s1776_s15, %s1783_s11, %s1968_s4, %s1968_s4, %s1967_s2  }
  0xaf   : > { %s328_s12 = scalar_lea.vmem [#allocation8], %s1758_s16  ;;  %s324_s17 = sand.u32 1, %s1524_s26  }
  0xb0   : > { %s335_s10 = sshll.u32 %s328_s12, 4  ;;  %s1818_s14 = scalar_lea.sflag [#allocation9], %s324_s17  ;;  %s1816_s10 = int_to_ptr.vmem [resolvable:$true] %s335_s10 }
  0xb1   : > { %s1396_s18 = scalar_lea.hbm %s1781_s8, 128  ;;  %s1401_s3 = scalar_lea.hbm %s1932_s1, 256 }
  0xb2   : > { %p1397_p2 = scmp.ne.s32.totalorder %s1781_s8, %s1396_s18  ;;  %p1402_p10 = scmp.lt.u32.totalorder %s1781_s8, %s1932_s1 }
  0xb3   : > { %p1403_p3 = scmp.lt.u32.totalorder %s1401_s3, %s1396_s18  ;;  %p1405_p9 = scmp.lt.u32.totalorder %s1396_s18, %s1781_s8 }
  0xb4   : > { %p1399_p8 = pnand %p1397_p2, %p1368_p12 }
  0xb5   : > { %p1404_p7 = por %p1403_p3, %p1402_p10 }
  0xb6   : > { %p1400_p6 = pneg %p1399_p8 }
  0xb7   : > { %p1406_p0 = por %p1405_p9, %p1404_p7 }
  0xb9   : > { %p1407_p1 = pnand %p1406_p0, %p1400_p6 }
  0xbb   : > { %1410 = shalt.err (!%p1407_p1)
}
  0xbc   : > { %s1411_s16 = scalar_lea.vmem %s1816_s10, 128  ;;  %s1535_s9 = smov [#allocation8]  }
  0xbd   : > { %p1412_p13 = scmp.ne.s32.totalorder %s1816_s10, %s1411_s16  ;;  %s1416_s15 = sshll.u32 %s1535_s9, 4  ;;  %s1417_s15 = int_to_ptr.vmem [resolvable:$false] %s1416_s15 }
  0xbe   : > { %s1418_s0 = scalar_lea.vmem %s1417_s15, 256  ;;  %p1419_p8 = scmp.lt.s32.totalorder %s1816_s10, %s1417_s15 }
  0xbf   : > { %p1414_p4 = pnand %p1412_p13, %p1368_p12  ;;  %p1420_p10 = scmp.lt.s32.totalorder %s1418_s0, %s1411_s16 }
  0xc1   : > { %p1415_p2 = pneg %p1414_p4  ;;  %p1421_p3 = por %p1420_p10, %p1419_p8 }
  0xc3   : > { %p1422_p7 = pnand %p1421_p3, %p1415_p2 }
  0xc5   : > { %1425 = shalt.err (!%p1422_p7)
}
  0xc6   : > { %1154 = dma.hbm_to_vmem [thread:$0]  (!%p1772_p11), %s1781_s8, 128, %s1816_s10, %s1818_s14, %s1968_s4, %s1968_s4, %s1967_s2  }
  0xc7   : > { %p1969_p12 = scmp.ne.s32.totalorder %s1956_s7, 0 }
  0xc8   : > { %s1850_s5 = sand.u32 (!%p1969_p12), 1, %s1508_s22   ;;  %p1970_p6 = scmp.ne.s32.totalorder (!%p1969_p12), %s1953_s29, 0 }
  0xc9   : > { %347 = sbr.rel (%p1969_p12) target bundleno = 793 (0x319), region = 44  ;;  %s1014_s11 = sshll.u32 (!%p1969_p12), %s1850_s5, 3 }
  0xca   : > { %s350_s12 = scalar_lea.sflag (!%p1969_p12), [#allocation6], %s1850_s5  ;;  %s353_s17 = scalar_lea.vmem (!%p1969_p12), [#allocation5], %s1014_s11 }
  0xd0   : > { %1479 = dma.done.wait (%p1970_p6), %s350_s12, 128  }
  0xd1   : > { %1481 = vsyncadd (%p1970_p6), %s350_s12, 4294967168  ;;  %s358_s21 = sand.u32 1, %s1608_s27   ;;  %s362_s7 = scalar_lea.vmem [#allocation8], %s1014_s11 }
  0xd2   : > { %s359_s8 = scalar_lea.sflag [#allocation9], %s358_s21 }
  0xd3   : > { %1483 = dma.done.wait (%p1970_p6), %s359_s8, 128  }
  0xd4   : > { %1485 = vsyncadd (%p1970_p6), %s359_s8, 4294967168  ;;  %p1971_p11 = scmp.eq.s32.totalorder %s1608_s27, 0 }
  0xd6   : > { %1487 = dma.done.wait (%p1971_p11), [#allocation9], 256   ;;  %p1972_p9 = pmov %p1971_p11 }
  0xd8   : > { %1489 = vsyncadd (%p1972_p9), [#allocation9], 4294967040  ;;  %p1973_p0 = pmov %p1972_p9 }
  0xda   : > { %1491 = dma.done.wait (%p1973_p0), [#allocation12], 1280   ;;  %p1974_p1 = pmov %p1973_p0 }
  0xdb   : > { %p1975_p13 = pmov %p1973_p0 }
  0xdc   : > { %1493 = vsyncadd (%p1974_p1), [#allocation12], 4294966016 }
  0xdd   : > { %1495 = dma.done.wait (%p1975_p13), [#allocation15], 1024   ;;  %p1976_p4 = pmov %p1973_p0 }
  0xde   : > { %v1536_v0 = vmov 0   ;;  %v1230_v1 = vld [vmem:[%s353_s17] sm:$0xff]   ;;  %v1231_v2 = vld [vmem:[%s362_s7] sm:$0xff]   ;;  %v1537_v7 = vmov 0.0   ;;  %vm446_vm0 = vcmask 130048   ;;  %vm1538_vm1 = vmmov 0  }
  0xdf   : > { %1497 = vsyncadd (%p1976_p4), [#allocation15], 4294966272  ;;  %524 = vmatprep.mubr.bf16.mxu0 %v1536_v0  ;;  %583 = vmatprep.mubr.bf16.mxu1 %v1536_v0  ;;  %v1232_v3 = vld [vmem:[#allocation10 + $0x4] ss:$8 sps:$4 sm:$0xff]   ;;  %v1234_v4 = vld [vmem:[#allocation10] ss:$8 sps:$4 sm:$0xff]  }
  0xe0   : > { %430 = vxpose.xlu0.c.b16.start.end [1/1] (short) (narrow) %v1230_v1, 16  ;;  %492 = vmatprep.subr.bf16.mxu0 %v1232_v3  ;;  %v1235_v5 = vld [vmem:[#allocation11 + $0x4] ss:$8 sps:$4 sm:$0xff]   ;;  %v1237_v6 = vld [vmem:[#allocation11] ss:$8 sps:$4 sm:$0xff]   ;;  %v1239_v10 = vld [vmem:[#allocation13] sm:$0xff]  }
  0xe1   : > { %493 = vmatpush1.bf16.msra.mxu0 %v1234_v4  ;;  %551 = vmatprep.subr.bf16.mxu1 %v1235_v5  ;;  %v1238_v12 = vld [vmem:[#allocation14] sm:$0xff]   ;;  %v1241_v13 = vld [vmem:[#allocation13 + $0x8] sm:$0xff]   ;;  %v1243_v16 = vld [vmem:[#allocation13 + $0x10] sm:$0xff]   ;;  %s1020_s27 = sshll.u32 %s1850_s5, 4  ;;  %s1052_s4 = sshll.u32 %s1516_s24, 8 }
  0xe2   : > { %552 = vmatpush1.bf16.msra.mxu1 %v1237_v6  ;;  %1091 = vmatprep.subr.bf16.mxu0 %v1537_v7  ;;  %v1240_v15 = vld [vmem:[#allocation14 + $0x8] sm:$0xff]   ;;  %v1242_v17 = vld [vmem:[#allocation14 + $0x10] sm:$0xff]   ;;  %v1245_v18 = vld [vmem:[#allocation13 + $0x18] sm:$0xff]   ;;  %s411_s29 = scalar_lea.vmem [#allocation16], %s1020_s27  ;;  %s1882_s18 = scalar_lea.hbm %s1937_s6, %s1052_s4 }
  0xe3   : > { %1071 = vmatprep.subr.bf16.mxu1 %v1537_v7  ;;  %v1244_v19 = vld [vmem:[#allocation14 + $0x18] sm:$0xff]   ;;  %v1246_v20 = vld [vmem:[#allocation14 + $0x20] sm:$0xff]   ;;  %v1248_v22 = vld [vmem:[#allocation14 + $0x28] sm:$0xff]   ;;  %s849_s2 = sshll.u32 %s411_s29, 4  ;;  %s836_s24 = scalar_lea.sflag [#allocation7], %s1850_s5  ;;  %s1877_s2 = int_to_ptr.vmem [resolvable:$true] %s849_s2 }
  0xe4   : > { %456 = vxpose.xlu0.c.b16.start.end [1/1] (short) (narrow) %v1231_v2, 16  ;;  %v1247_v21 = vld [vmem:[#allocation13 + $0x20] sm:$0xff]   ;;  %v1249_v23 = vld [vmem:[#allocation13 + $0x28] sm:$0xff]   ;;  %v1250_v24 = vld [vmem:[#allocation14 + $0x30] sm:$0xff]   ;;  %s1426_s13 = scalar_lea.vmem %s1877_s2, 256  ;;  %s1539_s19 = smov [#allocation16]  }
  0xe5   : > { %v1251_v25 = vld [vmem:[#allocation13 + $0x30] sm:$0xff]   ;;  %v1252_v26 = vld [vmem:[#allocation14 + $0x38] sm:$0xff]   ;;  %p1427_p2 = scmp.ne.s32.totalorder %s1877_s2, %s1426_s13  ;;  %s1430_s3 = sshll.u32 %s1539_s19, 4  ;;  %s1431_s3 = int_to_ptr.vmem [resolvable:$false] %s1430_s3 }
  0xe6   : > { %v1253_v27 = vld [vmem:[#allocation13 + $0x38] sm:$0xff]   ;;  %s1432_s16 = scalar_lea.vmem %s1431_s3, 512  ;;  %p1433_p3 = scmp.lt.s32.totalorder %s1877_s2, %s1431_s3 }
  0xe7   : > { %p1428_p8 = pnand %p1427_p2, %p1751_p5  ;;  %p1434_p7 = scmp.lt.s32.totalorder %s1432_s16, %s1426_s13 }
  0xe9   : > { %p1429_p10 = pneg %p1428_p8  ;;  %p1435_p12 = por %p1434_p7, %p1433_p3 }
  0xeb   : > { %p1436_p6 = pnand %p1435_p12, %p1429_p10 }
 0x146   : > { %v438_v8 = vpop.trf.xlu0 }
 0x147   : > { %447 = vst.msk [vmem:[#allocation2] sm:$0xff] %vm446_vm0, %v438_v8 }
 0x14a   : > { %v464_v9 = vpop.trf.xlu0 }
 0x14b   : > { %472 = vst.msk [vmem:[#allocation3] sm:$0xff] %vm446_vm0, %v464_v9 }
 0x14e   : > { %v475_v11 = vld [vmem:[#allocation2] sm:$0xff] }
 0x14f   : > { %1025 = vmatmul.mubr.msk.bf16.vlgmr.msra.gmra.mrb[0].mxu0 %vm446_vm0, %v475_v11 }
 0x150   : > { %1092 = vmatpush3.bf16.msra.mxu0 %v1239_v10  ;;  %1107 = vmatprep.mubr.msk.bf16.mxu0 %vm1538_vm1, %v1537_v7 }
 0x151   : > { %1093 = vmatprep.subr.bf16.mxu0 %v1537_v7 }
 0x152   : > { %v535_v14 = vld [vmem:[#allocation3] sm:$0xff] }
 0x153   : > { %1028 = vmatmul.mubr.msk.bf16.vlgmr.msra.gmra.mrb[0].mxu1 %vm446_vm0, %v535_v14 }
 0x154   : > { %1072 = vmatpush3.bf16.msra.mxu1 %v1238_v12  ;;  %1094 = vmatpush3.bf16.msra.mxu0 %v1241_v13 }
 0x155   : > { %1073 = vmatprep.subr.bf16.mxu1 %v1537_v7  ;;  %1095 = vmatprep.subr.bf16.mxu0 %v1537_v7 }
 0x156   : > { %1087 = vmatprep.mubr.msk.bf16.mxu1 %vm1538_vm1, %v1537_v7 }
 0x158   : > { %1074 = vmatpush3.bf16.msra.mxu1 %v1240_v15  ;;  %1096 = vmatpush3.bf16.msra.mxu0 %v1243_v16 }
 0x159   : > { %1075 = vmatprep.subr.bf16.mxu1 %v1537_v7  ;;  %1097 = vmatprep.subr.bf16.mxu0 %v1537_v7 }
 0x15c   : > { %1076 = vmatpush3.bf16.msra.mxu1 %v1242_v17  ;;  %1098 = vmatpush3.bf16.msra.mxu0 %v1245_v18 }
 0x15d   : > { %1077 = vmatprep.subr.bf16.mxu1 %v1537_v7  ;;  %1099 = vmatprep.subr.bf16.mxu0 %v1537_v7 }
 0x160   : > { %1078 = vmatpush3.bf16.msra.mxu1 %v1244_v19  ;;  %1100 = vmatpush3.bf16.msra.mxu0 %v1247_v21 }
 0x161   : > { %1079 = vmatprep.subr.bf16.mxu1 %v1537_v7  ;;  %1101 = vmatprep.subr.bf16.mxu0 %v1537_v7 }
 0x164   : > { %1080 = vmatpush3.bf16.msra.mxu1 %v1246_v20  ;;  %1102 = vmatpush3.bf16.msra.mxu0 %v1249_v23 }
 0x165   : > { %1081 = vmatprep.subr.bf16.mxu1 %v1537_v7  ;;  %1103 = vmatprep.subr.bf16.mxu0 %v1537_v7 }
 0x168   : > { %1082 = vmatpush3.bf16.msra.mxu1 %v1248_v22  ;;  %1104 = vmatpush3.bf16.msra.mxu0 %v1251_v25 }
 0x169   : > { %1083 = vmatprep.subr.bf16.mxu1 %v1537_v7  ;;  %1105 = vmatprep.subr.bf16.mxu0 %v1537_v7 }
 0x16c   : > { %1084 = vmatpush3.bf16.msra.mxu1 %v1250_v24  ;;  %1106 = vmatpush3.bf16.msra.mxu0 %v1253_v27 }
 0x16d   : > { %1085 = vmatprep.subr.bf16.mxu1 %v1537_v7 }
 0x170   : > { %1086 = vmatpush3.bf16.msra.mxu1 %v1252_v26 }
 0x222   : > { %v526_v28 = vpop.f32.mrb[0].mxu0 }
 0x223   : > { %v528_v29 = vpop.f32.mrb[1].mxu0 }
 0x224   : > { %v530_v30 = vpop.f32.mrb[2].mxu0 }
 0x225   : > { %v532_v31 = vpop.f32.mrb[3].mxu0 }
 0x226   : > { %v585_v32 = vpop.f32.mrb[0].mxu1 }
 0x227   : > { %v594_v33 = vmul.f32 %v585_v32, %v526_v28  ;;  %v604_v34 = vmul.f32 %v585_v32, %v528_v29  ;;  %v587_v35 = vpop.f32.mrb[1].mxu1 }
 0x228   : > { %v596_v36 = vmul.f32 %v587_v35, %v528_v29  ;;  %v602_v37 = vmul.f32 %v587_v35, %v526_v28  ;;  %v589_v38 = vpop.f32.mrb[2].mxu1 }
 0x229   : > { %v595_v39 = vmul.f32 %v589_v38, %v530_v30  ;;  %v605_v40 = vmul.f32 %v589_v38, %v532_v31  ;;  %v591_v41 = vpop.f32.mrb[3].mxu1 }
 0x22a   : > { %v598_v42 = vsub.f32 %v594_v33, %v596_v36  ;;  %v606_v43 = vadd.f32 %v604_v34, %v602_v37  ;;  %v597_v44 = vmul.f32 %v591_v41, %v532_v31  ;;  %v603_v45 = vmul.f32 %v591_v41, %v530_v30 }
 0x22c   : > { %v599_v46 = vsub.f32 %v595_v39, %v597_v44  ;;  %v607_v47 = vadd.f32 %v605_v40, %v603_v45  ;;  %v600_v48 = vmul.f32 0.03125, %v598_v42  ;;  %v608_v49 = vmul.f32 0.03125, %v606_v43 }
 0x22e   : > { %v601_v50 = vmul.f32 0.03125, %v599_v46  ;;  %v609_v51 = vmul.f32 0.03125, %v607_v47 }
 0x230   : > { %v612_v52 = vpack.c.bf16 %v601_v50, %v600_v48  ;;  %v629_v53 = vpack.c.bf16 %v609_v51, %v608_v49 }
 0x232   : > { %1088 = vmatmul.mubr.bf16.vlgmr.msra.gmra.mrb[4].mxu1 %v629_v53  ;;  %1108 = vmatmul.mubr.bf16.vlgmr.msra.gmra.mrb[4].mxu0 %v612_v52 }
 0x305   : > { %v728_v54 = vpop.f32.mrb[4].mxu1  ;;  %v817_v55 = vpop.f32.mrb[4].mxu0 }
 0x306   : > { %v818_v56 = vadd.f32 %v817_v55, %v728_v54  ;;  %v1089_v57 = vpop.f32.mrb[5].mxu1  ;;  %v1109_v58 = vpop.f32.mrb[5].mxu0 }
 0x307   : > { %v731_v59 = vpop.f32.mrb[6].mxu1  ;;  %v820_v60 = vpop.f32.mrb[6].mxu0 }
 0x308   : > { %833 = vst [vmem:[%s411_s29] sm:$0xff] %v818_v56  ;;  %v821_v61 = vadd.f32 %v820_v60, %v731_v59  ;;  %v1090_v62 = vpop.f32.mrb[7].mxu1  ;;  %v1110_v63 = vpop.f32.mrb[7].mxu0 }
 0x30a   : > { %834 = vst [vmem:[%s411_s29 + $0x8] sm:$0xff] %v821_v61 }
 0x30b   : > { %1439 = shalt.err (!%p1436_p6)
}
 0x30c   : > { %s1440_s9 = scalar_lea.hbm %s1882_s18, 256  ;;  %s1444_s11 = scalar_lea.hbm %s1937_s6, 512 }
 0x30d   : > { %p1441_p11 = scmp.ne.s32.totalorder %s1882_s18, %s1440_s9  ;;  %p1445_p1 = scmp.lt.u32.totalorder %s1882_s18, %s1937_s6 }
 0x30e   : > { %p1446_p13 = scmp.lt.u32.totalorder %s1444_s11, %s1440_s9  ;;  %p1448_p2 = scmp.lt.u32.totalorder %s1440_s9, %s1882_s18 }
 0x30f   : > { %p1442_p9 = pnand %p1441_p11, %p1751_p5 }
 0x310   : > { %p1447_p4 = por %p1446_p13, %p1445_p1 }
 0x311   : > { %p1443_p0 = pneg %p1442_p9 }
 0x312   : > { %p1449_p8 = por %p1448_p2, %p1447_p4 }
 0x314   : > { %p1450_p10 = pnand %p1449_p8, %p1443_p0 }
 0x316   : > { %1453 = shalt.err (!%p1450_p10)
}
 0x317   : > { %s1540_s21 = smov 128   ;;  %s1541_s8 = smov 8  }
 0x318   : > { %1133 = dma.vmem_to_hbm [thread:$0]  (%p1751_p5), %s1877_s2, 256, %s1882_s18, %s836_s24, %s1540_s21, %s1540_s21, %s1541_s8  }
 0x319 PF: > { %s1977_s7 = sld [smem:[#allocation23_spill]]  ;;  %s1978_s27 = sld [smem:[#allocation24_spill]] }
 0x31a   : > { %p1980_p7 = scmp.ge.s32.totalorder %s1524_s26, 2 }
 0x31f   : > { %s864_s29 = sand.u32 1, %s1977_s7   ;;  %p1979_p3 = scmp.ne.s32.totalorder %s1978_s27, 0 }
 0x320   : > { %s865_s4 = scalar_lea.sflag [#allocation7], %s864_s29 }
 0x321   : > { %p1156_p12 = pnand %p1980_p7, %p1979_p3 }
 0x323   : > { %1499 = dma.done.wait (!%p1156_p12), %s865_s4, 256  }
 0x324   : > { %1501 = vsyncadd (!%p1156_p12), %s865_s4, 4294967040  ;;  %s27_s26 = sadd.s32 1, %s1524_s26   ;;  %s1981_s21 = smov %s1508_s22 }
 0x325   : > { %p24_p6 = scmp.ge.s32.totalorder %s27_s26, 4   ;;  %s1982_s22 = smov %s1512_s23 }
 0x326   : > { %s1983_s23 = smov %s1762_s28  ;;  %s1984_s24 = smov %s1520_s25 }
 0x327   : > { %s1985_s25 = smov %s1987_s20  ;;  %26 = sbr.rel (!%p24_p6) target bundleno = 16 (0x10), region = 130 }
 0x32e   :  { %870 = vsyncpa [#allocation6], 1 }
 0x32f   :  { %872 = vsyncpa [#allocation6 + $0x1], 1 }
 0x330   :  { %873 = vsyncpa [#allocation9], 1 }
 0x331   :  { %875 = vsyncpa [#allocation9 + $0x1], 1 }
 0x332   :  { %876 = vsyncpa [#allocation12], 1 }
 0x333   :  { %877 = vsyncpa [#allocation15], 1 }
 0x334   :  { %878 = vsyncpa [#allocation7], 1 }
 0x335   :  { %880 = vsyncpa [#allocation7 + $0x1], 1 }

</bundles_post_ra>
